<compile_context>
chip_gen: v7x
topology: tpu7x:2x2x1
jax: 0.10.0
libtpu: 0.0.40
codegen_flags: <defaults>
</compile_context>

<pallas_src>
import functools

import jax
import jax.numpy as jnp
from jax import lax
from jax.experimental import pallas as pl
from jax.experimental.pallas import tpu as pltpu


# ----------------------------- Pallas kernel ------------------------------- #

def cnn_feature_kernel(x_ref, mask_ref,
                       w1_ref, s1_ref, t1_ref,
                       w2_ref, s2_ref, t2_ref,
                       w3_ref, s3_ref, t3_ref,
                       pw_ref, pb_ref,
                       o_ref,
                       *, kernel_size, compute_dtype):
    """x_ref: [m, Din]; mask_ref: [K, m]; w*: [Cout, K*Cin] packed; scale/shift: [Cout,1];
    pw: [Dout, C3]; pb: [Dout, 1]; o_ref: [Dout, m] (lane-dense store)."""
    m = o_ref.shape[1]
    pad = kernel_size // 2
    mask = mask_ref[...]                       # [K, m], compute_dtype, reused by all layers

    def conv_bn_relu(h, w_ref, scale_ref, shift_ref):
        # h: [Cin, m] (compute_dtype) -> [Cout, m] (f32)
        cin = h.shape[0]
        # Input-side roll + boundary mask (commutes with the column-wise matmul).
        pieces = []
        for k in range(kernel_size):           # static unroll (K = 5)
            d = k - pad
            if d == 0:
                pieces.append(h)
            else:
                rolled = pltpu.roll(h, shift=(-d) % m, axis=1)   # XLU lane rotation
                pieces.append(rolled * mask[k:k + 1, :])
        if cin % 8 == 0:
            # im2col: one deep matmul per layer (contraction depth K*Cin).
            hs = jnp.concatenate(pieces, axis=0)                 # [K*Cin, m]
            y = jnp.dot(w_ref[...], hs, preferred_element_type=jnp.float32)
        else:
            # Sublane-misaligned Cin (e.g. raw input channels): per-tap matmuls.
            y = jnp.zeros((w_ref.shape[0], m), jnp.float32)
            for k in range(kernel_size):
                y = y + jnp.dot(w_ref[:, k * cin:(k + 1) * cin], pieces[k],
                                preferred_element_type=jnp.float32)
        y = y * scale_ref[...] + shift_ref[...]                  # fused BN + conv bias
        return jnp.maximum(y, 0.0)                               # ReLU (dropout = identity)

    # Fused input transpose: [m, Din] -> [Din, m] on the XLU (Din is tiny).
    h = x_ref[...].T.astype(compute_dtype)
    h = conv_bn_relu(h, w1_ref, s1_ref, t1_ref).astype(compute_dtype)
    h = conv_bn_relu(h, w2_ref, s2_ref, t2_ref).astype(compute_dtype)
    h = conv_bn_relu(h, w3_ref, s3_ref, t3_ref).astype(compute_dtype)
    out = jnp.dot(pw_ref[...], h, preferred_element_type=jnp.float32) + pb_ref[...]
    o_ref[...] = out.astype(o_ref.dtype)                         # lane-dense [Dout, m]


# ------------------------------- Wrapper ------------------------------------ #

def _tpu_arch():
    """(tensorcores_per_chip, preferred lane multiple, matmul compute dtype)."""
    try:
        kind = jax.devices()[0].device_kind.lower()
    except Exception:  # pragma: no cover
        kind = ""
    if "v7" in kind:
        return 2, 256, jnp.bfloat16     # 2 TCs/chip, 256-wide MXU
    if "v6" in kind:
        return 1, 256, jnp.bfloat16     # 1 TC, 256-wide MXU
    # v5e and older: 1 TC, 128-wide MXU, no bf16 VPU path -> stay f32.
    return 1, 128, jnp.float32


def _choose_tiling(batch, seq_len, num_cores, lane_mult, col_cap=1024):
    """Return (block_batch, padded_batch).  m = block_batch*seq_len columns per step.

    Single maximal block on 1-TC chips; >= num_cores (even) grid steps on multi-TC
    chips; block width rounded down to a multiple of lane_mult (else 128) so stores
    stay unmasked and layout-legal.  Batch is padded up to grid*block_batch.
    """
    max_bb = max(1, col_cap // seq_len)
    bb = min(batch, max_bb)
    if num_cores > 1:
        bb = min(bb, -(-batch // num_cores))          # keep >= num_cores steps
    chosen = None
    for mult in (lane_mult, 128):
        cand = bb
        while cand >= 1 and (cand * seq_len) % mult:
            cand -= 1
        if cand >= 1:
            chosen = cand
            break
    if chosen is None:
        return batch, batch                           # one full block (fallback)
    bb = chosen
    grid = -(-batch // bb)
    if num_cores > 1 and grid % num_cores:
        grid += num_cores - grid % num_cores          # even grid for dual-TC chips
    return bb, grid * bb


def cnn_feature_extractor(x, params, output_dim, *, block_batch=None,
                          compute_dtype=None):
    """x: [B, S, Din] float32 -> [B, S, output_dim] float32."""
    B, S, Din = x.shape
    (w1, s1, t1), (w2, s2, t2), (w3, s3, t3), (pw, pb) = params
    K = w1.shape[0]
    assert K % 2 == 1, "padding='same' folding assumes an odd kernel size"
    pad = K // 2

    num_cores, lane_mult, auto_dtype = _tpu_arch()
    if compute_dtype is None:
        compute_dtype = auto_dtype

    if block_batch is None:
        block_batch, b_pad = _choose_tiling(B, S, num_cores, lane_mult)
    else:
        b_pad = -(-B // block_batch) * block_batch
    m = block_batch * S
    grid = (b_pad // block_batch,)

    # Pack conv weights as [Cout, K*Cin] (matches the kernel's stacked-RHS order)
    # and cast matmul operands to the compute dtype; BN affine params stay f32.
    def pack(w):  # w: [K, Cout, Cin]
        k, co, ci = w.shape
        return jnp.transpose(w, (1, 0, 2)).reshape(co, k * ci).astype(compute_dtype)
    wp1, wp2, wp3 = pack(w1), pack(w2), pack(w3)
    pwc = pw.astype(compute_dtype)

    # Natural [B*S, Din] layout (pure reshape, no HBM transpose); pad batch if needed.
    x2d = x.reshape(B * S, Din)
    if b_pad != B:
        x2d = jnp.pad(x2d, ((0, (b_pad - B) * S), (0, 0)))

    # Precomputed boundary masks (shared by all layers / grid steps): masks[k, c] == 1
    # iff the tap-k source column c + (k - pad) stays inside column c's sequence.
    pos = jnp.arange(m, dtype=jnp.int32) % S
    mask_rows = []
    for k in range(K):
        d = k - pad
        lo, hi = max(0, -d), S - max(0, d)
        mask_rows.append(((pos >= lo) & (pos < hi)).astype(compute_dtype))
    masks = jnp.stack(mask_rows, axis=0)                 # [K, m]

    def const_spec(arr):
        nd = arr.ndim
        return pl.BlockSpec(arr.shape, lambda b, _nd=nd: (0,) * _nd)  # VMEM-resident

    in_specs = [
        pl.BlockSpec((m, Din), lambda b: (b, 0)),        # activation slab (contiguous)
        const_spec(masks),
        const_spec(wp1), const_spec(s1), const_spec(t1),
        const_spec(wp2), const_spec(s2), const_spec(t2),
        const_spec(wp3), const_spec(s3), const_spec(t3),
        const_spec(pwc), const_spec(pb),
    ]
    out_spec = pl.BlockSpec((output_dim, m), lambda b: (0, b))

    c1, c2, c3 = w1.shape[1], w2.shape[1], w3.shape[1]
    flops = 2 * b_pad * S * (K * (Din * c1 + c1 * c2 + c2 * c3) + c3 * output_dim)
    bytes_accessed = (x2d.size * x2d.dtype.itemsize + b_pad * S * output_dim * 4
                      + sum(a.size * a.dtype.itemsize
                            for a in (masks, wp1, s1, t1, wp2, s2, t2,
                                      wp3, s3, t3, pwc, pb)))

    kernel = functools.partial(cnn_feature_kernel, kernel_size=K,
                               compute_dtype=compute_dtype)

    out_t = pl.pallas_call(
        kernel,
        out_shape=jax.ShapeDtypeStruct((output_dim, b_pad * S), jnp.float32),
        grid_spec=pltpu.PrefetchScalarGridSpec(
            num_scalar_prefetch=0,
            grid=grid,
            in_specs=in_specs,
            out_specs=out_spec,
        ),
        compiler_params=pltpu.CompilerParams(
            dimension_semantics=("parallel",)),
        cost_estimate=pl.CostEstimate(flops=flops, transcendentals=0,
                                      bytes_accessed=bytes_accessed),
    )(x2d, masks, wp1, s1, t1, wp2, s2, t2, wp3, s3, t3, pwc, pb)

    # [Dout, B_pad*S] (lane-dense kernel output) -> [B, S, Dout]
    out_t = out_t[:, :B * S]
    return jnp.transpose(out_t).reshape(B, S, output_dim)


# ------------------------- Parameter construction --------------------------- #

def make_params(key, input_dim, channels, kernel_size, output_dim, eps=1e-5):
    """Deterministic synthetic parameters (PyTorch init shapes), BN folded to affine.

    Per conv layer: (w [K, Cout, Cin], scale [Cout, 1], shift [Cout, 1]).
    Projection: (pw [Dout, C_last], pb [Dout, 1]).
    """
    params = []
    cin = input_dim
    for cout in channels:
        key, kw, kb, kg, kbe, km, kv = jax.random.split(key, 7)
        # Conv1d weight [Cout, Cin, K], bias [Cout]  (torch convention)
        w = jax.random.normal(kw, (cout, cin, kernel_size), jnp.float32) * 0.1
        b = jax.random.normal(kb, (cout,), jnp.float32) * 0.1
        # BatchNorm1d (eval): gamma, beta, running_mean, running_var
        gamma = 1.0 + 0.1 * jax.random.normal(kg, (cout,), jnp.float32)
        beta = 0.1 * jax.random.normal(kbe, (cout,), jnp.float32)
        rmean = 0.1 * jax.random.normal(km, (cout,), jnp.float32)
        rvar = jnp.abs(1.0 + 0.1 * jax.random.normal(kv, (cout,), jnp.float32))
        scale = gamma / jnp.sqrt(rvar + eps)
        shift = scale * (b - rmean) + beta                   # folds conv bias
        w_koi = jnp.transpose(w, (2, 0, 1))                  # [K, Cout, Cin]
        params.append((w_koi, scale[:, None], shift[:, None]))
        cin = cout
    key, kpw, kpb = jax.random.split(key, 3)
    pw = jax.random.normal(kpw, (output_dim, cin), jnp.float32) * 0.1
    pb = jax.random.normal(kpb, (output_dim,), jnp.float32) * 0.1
    params.append((pw, pb[:, None]))
    return params


# ------------------------------ JAX reference -------------------------------- #

def reference(x, params):
    (w1, s1, t1), (w2, s2, t2), (w3, s3, t3), (pw, pb) = params
    h = jnp.transpose(x, (0, 2, 1))                          # [B, C, S]
    for (w, sc, sh) in ((w1, s1, t1), (w2, s2, t2), (w3, s3, t3)):
        w_oih = jnp.transpose(w, (1, 2, 0))                  # [Cout, Cin, K]
        h = lax.conv_general_dilated(
            h, w_oih, window_strides=(1,), padding="SAME",
            dimension_numbers=("NCH", "OIH", "NCH"))
        h = h * sc[None, :, :] + sh[None, :, :]
        h = jnp.maximum(h, 0.0)
    h = jnp.transpose(h, (0, 2, 1))                          # [B, S, C]
    return jnp.einsum("bsc,dc->bsd", h, pw) + pb[:, 0]


# --------------------------------- Main -------------------------------------- #

if __name__ == "__main__":
    B, S = 8, 32
    input_dim, output_dim = 4, 8
    channels = [8, 16, 32]
    kernel_size = 5

    key = jax.random.PRNGKey(0)
    key, kx = jax.random.split(key)
    x = jax.random.normal(kx, (B, S, input_dim), jnp.float32)

    params = make_params(key, input_dim, channels, kernel_size, output_dim)

    run = jax.jit(functools.partial(cnn_feature_extractor, output_dim=output_dim))
    out = jax.block_until_ready(run(x, params))

    ref = reference(x, params)
    assert out.shape == (B, S, output_dim)
    err = float(jnp.max(jnp.abs(out - ref)))
    # bf16 MXU inputs with f32 accumulation (v6e/v7x) vs f32 reference: allow ~1e-2.
    assert jnp.allclose(out, ref, atol=3e-2, rtol=3e-2), f"max abs err {err}"
    print("KERNEL_OK")
</pallas_src>

<mosaic_0001>
module attributes {stable_mosaic.version = 11 : i64} {
  func.func @cnn_feature_kernel(%arg0: i32, %arg1: memref<256x4xf32, #tpu.memory_space<vmem>>, %arg2: memref<5x256xf32, #tpu.memory_space<vmem>>, %arg3: memref<8x20xf32, #tpu.memory_space<vmem>>, %arg4: memref<8x1xf32, #tpu.memory_space<vmem>>, %arg5: memref<8x1xf32, #tpu.memory_space<vmem>>, %arg6: memref<16x40xf32, #tpu.memory_space<vmem>>, %arg7: memref<16x1xf32, #tpu.memory_space<vmem>>, %arg8: memref<16x1xf32, #tpu.memory_space<vmem>>, %arg9: memref<32x80xf32, #tpu.memory_space<vmem>>, %arg10: memref<32x1xf32, #tpu.memory_space<vmem>>, %arg11: memref<32x1xf32, #tpu.memory_space<vmem>>, %arg12: memref<8x32xf32, #tpu.memory_space<vmem>>, %arg13: memref<8x1xf32, #tpu.memory_space<vmem>>, %arg14: memref<8x256xf32, #tpu.memory_space<vmem>>) attributes {dimension_semantics = [#tpu.dimension_semantics<parallel>], iteration_bounds = array<i64: 1>, scalar_prefetch = 0 : i64, scratch_operands = 0 : i64, tpu.core_type = #tpu.core_type<tc>, window_params = [{transform_indices = @transform_0, window_bounds = array<i64: 256, 4>}, {pipeline_mode = #tpu.pipeline_mode<synchronous>, transform_indices = @transform_1, window_bounds = array<i64: 5, 256>}, {pipeline_mode = #tpu.pipeline_mode<synchronous>, transform_indices = @transform_2, window_bounds = array<i64: 8, 20>}, {pipeline_mode = #tpu.pipeline_mode<synchronous>, transform_indices = @transform_3, window_bounds = array<i64: 8, 1>}, {pipeline_mode = #tpu.pipeline_mode<synchronous>, transform_indices = @transform_4, window_bounds = array<i64: 8, 1>}, {pipeline_mode = #tpu.pipeline_mode<synchronous>, transform_indices = @transform_5, window_bounds = array<i64: 16, 40>}, {pipeline_mode = #tpu.pipeline_mode<synchronous>, transform_indices = @transform_6, window_bounds = array<i64: 16, 1>}, {pipeline_mode = #tpu.pipeline_mode<synchronous>, transform_indices = @transform_7, window_bounds = array<i64: 16, 1>}, {pipeline_mode = #tpu.pipeline_mode<synchronous>, transform_indices = @transform_8, window_bounds = array<i64: 32, 80>}, {pipeline_mode = #tpu.pipeline_mode<synchronous>, transform_indices = @transform_9, window_bounds = array<i64: 32, 1>}, {pipeline_mode = #tpu.pipeline_mode<synchronous>, transform_indices = @transform_10, window_bounds = array<i64: 32, 1>}, {pipeline_mode = #tpu.pipeline_mode<synchronous>, transform_indices = @transform_11, window_bounds = array<i64: 8, 32>}, {pipeline_mode = #tpu.pipeline_mode<synchronous>, transform_indices = @transform_12, window_bounds = array<i64: 8, 1>}, {transform_indices = @transform_13, window_bounds = array<i64: 8, 256>}]} {
    %c0 = arith.constant 0 : index
    %c0_0 = arith.constant 0 : index
    %0 = vector.load %arg2[%c0, %c0_0] : memref<5x256xf32, #tpu.memory_space<vmem>>, vector<5x256xf32>
    %c0_1 = arith.constant 0 : index
    %c0_2 = arith.constant 0 : index
    %1 = vector.load %arg1[%c0_1, %c0_2] : memref<256x4xf32, #tpu.memory_space<vmem>>, vector<256x4xf32>
    %2 = tpu.transpose %1, [1, 0] : vector<256x4xf32> -> vector<4x256xf32>
    %c2_i32 = arith.constant 2 : i32
    %3 = tpu.dynamic_rotate %2 by %c2_i32 dim 1 : vector<4x256xf32>, i32 -> vector<4x256xf32>
    %4 = vector.extract_strided_slice %0 {offsets = [0, 0], sizes = [1, 256], strides = [1, 1]} : vector<5x256xf32> to vector<1x256xf32>
    %5 = vector.broadcast %4 : vector<1x256xf32> to vector<4x256xf32>
    %6 = arith.mulf %3, %5 : vector<4x256xf32>
    %c1_i32 = arith.constant 1 : i32
    %7 = tpu.dynamic_rotate %2 by %c1_i32 dim 1 : vector<4x256xf32>, i32 -> vector<4x256xf32>
    %8 = vector.extract_strided_slice %0 {offsets = [1, 0], sizes = [1, 256], strides = [1, 1]} : vector<5x256xf32> to vector<1x256xf32>
    %9 = vector.broadcast %8 : vector<1x256xf32> to vector<4x256xf32>
    %10 = arith.mulf %7, %9 : vector<4x256xf32>
    %c255_i32 = arith.constant 255 : i32
    %11 = tpu.dynamic_rotate %2 by %c255_i32 dim 1 : vector<4x256xf32>, i32 -> vector<4x256xf32>
    %12 = vector.extract_strided_slice %0 {offsets = [3, 0], sizes = [1, 256], strides = [1, 1]} : vector<5x256xf32> to vector<1x256xf32>
    %13 = vector.broadcast %12 : vector<1x256xf32> to vector<4x256xf32>
    %14 = arith.mulf %11, %13 : vector<4x256xf32>
    %c254_i32 = arith.constant 254 : i32
    %15 = tpu.dynamic_rotate %2 by %c254_i32 dim 1 : vector<4x256xf32>, i32 -> vector<4x256xf32>
    %16 = vector.extract_strided_slice %0 {offsets = [4, 0], sizes = [1, 256], strides = [1, 1]} : vector<5x256xf32> to vector<1x256xf32>
    %17 = vector.broadcast %16 : vector<1x256xf32> to vector<4x256xf32>
    %18 = arith.mulf %15, %17 : vector<4x256xf32>
    %cst = arith.constant 0.000000e+00 : f32
    %19 = vector.broadcast %cst : f32 to vector<8x256xf32>
    %c0_3 = arith.constant 0 : index
    %c0_4 = arith.constant 0 : index
    %20 = vector.load %arg3[%c0_3, %c0_4] : memref<8x20xf32, #tpu.memory_space<vmem>>, vector<8x4xf32>
    %cst_5 = arith.constant dense<0.000000e+00> : vector<8x256xf32>
    %21 = tpu.matmul %20, %6, %cst_5 {dimension_numbers = #tpu.dot_dimension_numbers<[1], [0], [0], [1], [0, 0, 1, 1], [], []>} : vector<8x4xf32>, vector<4x256xf32>, vector<8x256xf32> -> vector<8x256xf32>
    %22 = arith.addf %19, %21 : vector<8x256xf32>
    %c0_6 = arith.constant 0 : index
    %c4 = arith.constant 4 : index
    %23 = vector.load %arg3[%c0_6, %c4] : memref<8x20xf32, #tpu.memory_space<vmem>>, vector<8x4xf32>
    %cst_7 = arith.constant dense<0.000000e+00> : vector<8x256xf32>
    %24 = tpu.matmul %23, %10, %cst_7 {dimension_numbers = #tpu.dot_dimension_numbers<[1], [0], [0], [1], [0, 0, 1, 1], [], []>} : vector<8x4xf32>, vector<4x256xf32>, vector<8x256xf32> -> vector<8x256xf32>
    %25 = arith.addf %22, %24 : vector<8x256xf32>
    %c0_8 = arith.constant 0 : index
    %c8 = arith.constant 8 : index
    %26 = vector.load %arg3[%c0_8, %c8] : memref<8x20xf32, #tpu.memory_space<vmem>>, vector<8x4xf32>
    %cst_9 = arith.constant dense<0.000000e+00> : vector<8x256xf32>
    %27 = tpu.matmul %26, %2, %cst_9 {dimension_numbers = #tpu.dot_dimension_numbers<[1], [0], [0], [1], [0, 0, 1, 1], [], []>} : vector<8x4xf32>, vector<4x256xf32>, vector<8x256xf32> -> vector<8x256xf32>
    %28 = arith.addf %25, %27 : vector<8x256xf32>
    %c0_10 = arith.constant 0 : index
    %c12 = arith.constant 12 : index
    %29 = vector.load %arg3[%c0_10, %c12] : memref<8x20xf32, #tpu.memory_space<vmem>>, vector<8x4xf32>
    %cst_11 = arith.constant dense<0.000000e+00> : vector<8x256xf32>
    %30 = tpu.matmul %29, %14, %cst_11 {dimension_numbers = #tpu.dot_dimension_numbers<[1], [0], [0], [1], [0, 0, 1, 1], [], []>} : vector<8x4xf32>, vector<4x256xf32>, vector<8x256xf32> -> vector<8x256xf32>
    %31 = arith.addf %28, %30 : vector<8x256xf32>
    %c0_12 = arith.constant 0 : index
    %c16 = arith.constant 16 : index
    %32 = vector.load %arg3[%c0_12, %c16] : memref<8x20xf32, #tpu.memory_space<vmem>>, vector<8x4xf32>
    %cst_13 = arith.constant dense<0.000000e+00> : vector<8x256xf32>
    %33 = tpu.matmul %32, %18, %cst_13 {dimension_numbers = #tpu.dot_dimension_numbers<[1], [0], [0], [1], [0, 0, 1, 1], [], []>} : vector<8x4xf32>, vector<4x256xf32>, vector<8x256xf32> -> vector<8x256xf32>
    %34 = arith.addf %31, %33 : vector<8x256xf32>
    %c0_14 = arith.constant 0 : index
    %c0_15 = arith.constant 0 : index
    %35 = vector.load %arg4[%c0_14, %c0_15] : memref<8x1xf32, #tpu.memory_space<vmem>>, vector<8x1xf32>
    %36 = vector.broadcast %35 : vector<8x1xf32> to vector<8x256xf32>
    %37 = arith.mulf %34, %36 : vector<8x256xf32>
    %c0_16 = arith.constant 0 : index
    %c0_17 = arith.constant 0 : index
    %38 = vector.load %arg5[%c0_16, %c0_17] : memref<8x1xf32, #tpu.memory_space<vmem>>, vector<8x1xf32>
    %39 = vector.broadcast %38 : vector<8x1xf32> to vector<8x256xf32>
    %40 = arith.addf %37, %39 : vector<8x256xf32>
    %cst_18 = arith.constant 0.000000e+00 : f32
    %41 = vector.broadcast %cst_18 : f32 to vector<8x256xf32>
    %42 = arith.maximumf %40, %41 : vector<8x256xf32>
    %c2_i32_19 = arith.constant 2 : i32
    %43 = tpu.dynamic_rotate %42 by %c2_i32_19 dim 1 : vector<8x256xf32>, i32 -> vector<8x256xf32>
    %44 = vector.extract_strided_slice %0 {offsets = [0, 0], sizes = [1, 256], strides = [1, 1]} : vector<5x256xf32> to vector<1x256xf32>
    %45 = vector.broadcast %44 : vector<1x256xf32> to vector<8x256xf32>
    %46 = arith.mulf %43, %45 : vector<8x256xf32>
    %c1_i32_20 = arith.constant 1 : i32
    %47 = tpu.dynamic_rotate %42 by %c1_i32_20 dim 1 : vector<8x256xf32>, i32 -> vector<8x256xf32>
    %48 = vector.extract_strided_slice %0 {offsets = [1, 0], sizes = [1, 256], strides = [1, 1]} : vector<5x256xf32> to vector<1x256xf32>
    %49 = vector.broadcast %48 : vector<1x256xf32> to vector<8x256xf32>
    %50 = arith.mulf %47, %49 : vector<8x256xf32>
    %c255_i32_21 = arith.constant 255 : i32
    %51 = tpu.dynamic_rotate %42 by %c255_i32_21 dim 1 : vector<8x256xf32>, i32 -> vector<8x256xf32>
    %52 = vector.extract_strided_slice %0 {offsets = [3, 0], sizes = [1, 256], strides = [1, 1]} : vector<5x256xf32> to vector<1x256xf32>
    %53 = vector.broadcast %52 : vector<1x256xf32> to vector<8x256xf32>
    %54 = arith.mulf %51, %53 : vector<8x256xf32>
    %c254_i32_22 = arith.constant 254 : i32
    %55 = tpu.dynamic_rotate %42 by %c254_i32_22 dim 1 : vector<8x256xf32>, i32 -> vector<8x256xf32>
    %56 = vector.extract_strided_slice %0 {offsets = [4, 0], sizes = [1, 256], strides = [1, 1]} : vector<5x256xf32> to vector<1x256xf32>
    %57 = vector.broadcast %56 : vector<1x256xf32> to vector<8x256xf32>
    %58 = arith.mulf %55, %57 : vector<8x256xf32>
    %59 = tpu.concatenate %46, %50, %42, %54, %58 in 0 : vector<8x256xf32>, vector<8x256xf32>, vector<8x256xf32>, vector<8x256xf32>, vector<8x256xf32> -> vector<40x256xf32>
    %c0_23 = arith.constant 0 : index
    %c0_24 = arith.constant 0 : index
    %60 = vector.load %arg6[%c0_23, %c0_24] : memref<16x40xf32, #tpu.memory_space<vmem>>, vector<16x40xf32>
    %cst_25 = arith.constant dense<0.000000e+00> : vector<16x256xf32>
    %61 = tpu.matmul %60, %59, %cst_25 {dimension_numbers = #tpu.dot_dimension_numbers<[1], [0], [0], [1], [0, 0, 1, 1], [], []>} : vector<16x40xf32>, vector<40x256xf32>, vector<16x256xf32> -> vector<16x256xf32>
    %c0_26 = arith.constant 0 : index
    %c0_27 = arith.constant 0 : index
    %62 = vector.load %arg7[%c0_26, %c0_27] : memref<16x1xf32, #tpu.memory_space<vmem>>, vector<16x1xf32>
    %63 = vector.broadcast %62 : vector<16x1xf32> to vector<16x256xf32>
    %64 = arith.mulf %61, %63 : vector<16x256xf32>
    %c0_28 = arith.constant 0 : index
    %c0_29 = arith.constant 0 : index
    %65 = vector.load %arg8[%c0_28, %c0_29] : memref<16x1xf32, #tpu.memory_space<vmem>>, vector<16x1xf32>
    %66 = vector.broadcast %65 : vector<16x1xf32> to vector<16x256xf32>
    %67 = arith.addf %64, %66 : vector<16x256xf32>
    %cst_30 = arith.constant 0.000000e+00 : f32
    %68 = vector.broadcast %cst_30 : f32 to vector<16x256xf32>
    %69 = arith.maximumf %67, %68 : vector<16x256xf32>
    %c2_i32_31 = arith.constant 2 : i32
    %70 = tpu.dynamic_rotate %69 by %c2_i32_31 dim 1 : vector<16x256xf32>, i32 -> vector<16x256xf32>
    %71 = vector.extract_strided_slice %0 {offsets = [0, 0], sizes = [1, 256], strides = [1, 1]} : vector<5x256xf32> to vector<1x256xf32>
    %72 = vector.broadcast %71 : vector<1x256xf32> to vector<16x256xf32>
    %73 = arith.mulf %70, %72 : vector<16x256xf32>
    %c1_i32_32 = arith.constant 1 : i32
    %74 = tpu.dynamic_rotate %69 by %c1_i32_32 dim 1 : vector<16x256xf32>, i32 -> vector<16x256xf32>
    %75 = vector.extract_strided_slice %0 {offsets = [1, 0], sizes = [1, 256], strides = [1, 1]} : vector<5x256xf32> to vector<1x256xf32>
    %76 = vector.broadcast %75 : vector<1x256xf32> to vector<16x256xf32>
    %77 = arith.mulf %74, %76 : vector<16x256xf32>
    %c255_i32_33 = arith.constant 255 : i32
    %78 = tpu.dynamic_rotate %69 by %c255_i32_33 dim 1 : vector<16x256xf32>, i32 -> vector<16x256xf32>
    %79 = vector.extract_strided_slice %0 {offsets = [3, 0], sizes = [1, 256], strides = [1, 1]} : vector<5x256xf32> to vector<1x256xf32>
    %80 = vector.broadcast %79 : vector<1x256xf32> to vector<16x256xf32>
    %81 = arith.mulf %78, %80 : vector<16x256xf32>
    %c254_i32_34 = arith.constant 254 : i32
    %82 = tpu.dynamic_rotate %69 by %c254_i32_34 dim 1 : vector<16x256xf32>, i32 -> vector<16x256xf32>
    %83 = vector.extract_strided_slice %0 {offsets = [4, 0], sizes = [1, 256], strides = [1, 1]} : vector<5x256xf32> to vector<1x256xf32>
    %84 = vector.broadcast %83 : vector<1x256xf32> to vector<16x256xf32>
    %85 = arith.mulf %82, %84 : vector<16x256xf32>
    %86 = tpu.concatenate %73, %77, %69, %81, %85 in 0 : vector<16x256xf32>, vector<16x256xf32>, vector<16x256xf32>, vector<16x256xf32>, vector<16x256xf32> -> vector<80x256xf32>
    %c0_35 = arith.constant 0 : index
    %c0_36 = arith.constant 0 : index
    %87 = vector.load %arg9[%c0_35, %c0_36] : memref<32x80xf32, #tpu.memory_space<vmem>>, vector<32x80xf32>
    %cst_37 = arith.constant dense<0.000000e+00> : vector<32x256xf32>
    %88 = tpu.matmul %87, %86, %cst_37 {dimension_numbers = #tpu.dot_dimension_numbers<[1], [0], [0], [1], [0, 0, 1, 1], [], []>} : vector<32x80xf32>, vector<80x256xf32>, vector<32x256xf32> -> vector<32x256xf32>
    %c0_38 = arith.constant 0 : index
    %c0_39 = arith.constant 0 : index
    %89 = vector.load %arg10[%c0_38, %c0_39] : memref<32x1xf32, #tpu.memory_space<vmem>>, vector<32x1xf32>
    %90 = vector.broadcast %89 : vector<32x1xf32> to vector<32x256xf32>
    %91 = arith.mulf %88, %90 : vector<32x256xf32>
    %c0_40 = arith.constant 0 : index
    %c0_41 = arith.constant 0 : index
    %92 = vector.load %arg11[%c0_40, %c0_41] : memref<32x1xf32, #tpu.memory_space<vmem>>, vector<32x1xf32>
    %93 = vector.broadcast %92 : vector<32x1xf32> to vector<32x256xf32>
    %94 = arith.addf %91, %93 : vector<32x256xf32>
    %cst_42 = arith.constant 0.000000e+00 : f32
    %95 = vector.broadcast %cst_42 : f32 to vector<32x256xf32>
    %96 = arith.maximumf %94, %95 : vector<32x256xf32>
    %c0_43 = arith.constant 0 : index
    %c0_44 = arith.constant 0 : index
    %97 = vector.load %arg12[%c0_43, %c0_44] : memref<8x32xf32, #tpu.memory_space<vmem>>, vector<8x32xf32>
    %cst_45 = arith.constant dense<0.000000e+00> : vector<8x256xf32>
    %98 = tpu.matmul %97, %96, %cst_45 {dimension_numbers = #tpu.dot_dimension_numbers<[1], [0], [0], [1], [0, 0, 1, 1], [], []>} : vector<8x32xf32>, vector<32x256xf32>, vector<8x256xf32> -> vector<8x256xf32>
    %c0_46 = arith.constant 0 : index
    %c0_47 = arith.constant 0 : index
    %99 = vector.load %arg13[%c0_46, %c0_47] : memref<8x1xf32, #tpu.memory_space<vmem>>, vector<8x1xf32>
    %100 = vector.broadcast %99 : vector<8x1xf32> to vector<8x256xf32>
    %101 = arith.addf %98, %100 : vector<8x256xf32>
    %c0_48 = arith.constant 0 : index
    %c0_49 = arith.constant 0 : index
    %102 = vector.load %arg14[%c0_48, %c0_49] : memref<8x256xf32, #tpu.memory_space<vmem>>, vector<8x256xf32>
    tpu.vector_store %arg14[%c0_48, %c0_49], %101 {strides = array<i32>} : memref<8x256xf32, #tpu.memory_space<vmem>>, vector<8x256xf32>,
    return
  }
  func.func @transform_0(%arg0: i32) -> (i32, i32) {
    %c0_i32 = arith.constant 0 : i32
    %c0_i32_0 = arith.constant 0 : i32
    return %arg0, %c0_i32 : i32, i32
  }
  func.func @transform_1(%arg0: i32) -> (i32, i32) {
    %c0_i32 = arith.constant 0 : i32
    %c0_i32_0 = arith.constant 0 : i32
    %c0_i32_1 = arith.constant 0 : i32
    return %c0_i32, %c0_i32_0 : i32, i32
  }
  func.func @transform_2(%arg0: i32) -> (i32, i32) {
    %c0_i32 = arith.constant 0 : i32
    %c0_i32_0 = arith.constant 0 : i32
    %c0_i32_1 = arith.constant 0 : i32
    return %c0_i32, %c0_i32_0 : i32, i32
  }
  func.func @transform_3(%arg0: i32) -> (i32, i32) {
    %c0_i32 = arith.constant 0 : i32
    %c0_i32_0 = arith.constant 0 : i32
    %c0_i32_1 = arith.constant 0 : i32
    return %c0_i32, %c0_i32_0 : i32, i32
  }
  func.func @transform_4(%arg0: i32) -> (i32, i32) {
    %c0_i32 = arith.constant 0 : i32
    %c0_i32_0 = arith.constant 0 : i32
    %c0_i32_1 = arith.constant 0 : i32
    return %c0_i32, %c0_i32_0 : i32, i32
  }
  func.func @transform_5(%arg0: i32) -> (i32, i32) {
    %c0_i32 = arith.constant 0 : i32
    %c0_i32_0 = arith.constant 0 : i32
    %c0_i32_1 = arith.constant 0 : i32
    return %c0_i32, %c0_i32_0 : i32, i32
  }
  func.func @transform_6(%arg0: i32) -> (i32, i32) {
    %c0_i32 = arith.constant 0 : i32
    %c0_i32_0 = arith.constant 0 : i32
    %c0_i32_1 = arith.constant 0 : i32
    return %c0_i32, %c0_i32_0 : i32, i32
  }
  func.func @transform_7(%arg0: i32) -> (i32, i32) {
    %c0_i32 = arith.constant 0 : i32
    %c0_i32_0 = arith.constant 0 : i32
    %c0_i32_1 = arith.constant 0 : i32
    return %c0_i32, %c0_i32_0 : i32, i32
  }
  func.func @transform_8(%arg0: i32) -> (i32, i32) {
    %c0_i32 = arith.constant 0 : i32
    %c0_i32_0 = arith.constant 0 : i32
    %c0_i32_1 = arith.constant 0 : i32
    return %c0_i32, %c0_i32_0 : i32, i32
  }
  func.func @transform_9(%arg0: i32) -> (i32, i32) {
    %c0_i32 = arith.constant 0 : i32
    %c0_i32_0 = arith.constant 0 : i32
    %c0_i32_1 = arith.constant 0 : i32
    return %c0_i32, %c0_i32_0 : i32, i32
  }
  func.func @transform_10(%arg0: i32) -> (i32, i32) {
    %c0_i32 = arith.constant 0 : i32
    %c0_i32_0 = arith.constant 0 : i32
    %c0_i32_1 = arith.constant 0 : i32
    return %c0_i32, %c0_i32_0 : i32, i32
  }
  func.func @transform_11(%arg0: i32) -> (i32, i32) {
    %c0_i32 = arith.constant 0 : i32
    %c0_i32_0 = arith.constant 0 : i32
    %c0_i32_1 = arith.constant 0 : i32
    return %c0_i32, %c0_i32_0 : i32, i32
  }
  func.func @transform_12(%arg0: i32) -> (i32, i32) {
    %c0_i32 = arith.constant 0 : i32
    %c0_i32_0 = arith.constant 0 : i32
    %c0_i32_1 = arith.constant 0 : i32
    return %c0_i32, %c0_i32_0 : i32, i32
  }
  func.func @transform_13(%arg0: i32) -> (i32, i32) {
    %c0_i32 = arith.constant 0 : i32
    %c0_i32_0 = arith.constant 0 : i32
    return %c0_i32, %arg0 : i32, i32
  }
}

</mosaic_0001>

<bundles_post_ra>
// kernel: cnn_feature_extractor.1
= control target key start
LH: loop header
LB: loop body
LE: loop exit
PB: predicated region body
PF: predicated region fallthrough
CT: control target
= control target key end

     0   :  { %v1205_v32 = vmov 0.0   ;;  %s1206_s21 = smov 2   ;;  %s1207_s24 = smov 120   ;;  %v1213_v36 = vmov 0   ;;  %v146_v39 = vlaneseq  ;;  %vm219_vm1 = vcmask 1043456   ;;  %s1673_s0 = inlined_call_operand.vmem [shape: f32[256,4], index: 0, kind: input, shape index: {}]   ;;  %s1674_s2 = inlined_call_operand.vmem [shape: f32[8,20], index: 2, kind: input, shape index: {}]   ;;  %s1675_s4 = inlined_call_operand.vmem [shape: f32[8,1], index: 4, kind: input, shape index: {}]   ;;  %s1676_s3 = inlined_call_operand.vmem [shape: f32[8,1], index: 3, kind: input, shape index: {}]   ;;  %s1677_s1 = inlined_call_operand.vmem [shape: f32[5,256], index: 1, kind: input, shape index: {}]   ;;  %s1678_s6 = inlined_call_operand.vmem [shape: f32[16,1], index: 6, kind: input, shape index: {}]   ;;  %s1679_s7 = inlined_call_operand.vmem [shape: f32[16,1], index: 7, kind: input, shape index: {}]   ;;  %s1680_s5 = inlined_call_operand.vmem [shape: f32[16,40], index: 5, kind: input, shape index: {}]   ;;  %s1681_s9 = inlined_call_operand.vmem [shape: f32[32,1], index: 9, kind: input, shape index: {}]   ;;  %s1682_s10 = inlined_call_operand.vmem [shape: f32[32,1], index: 10, kind: input, shape index: {}]   ;;  %s1683_s12 = inlined_call_operand.vmem [shape: f32[8,1], index: 12, kind: input, shape index: {}]   ;;  %s1684_s8 = inlined_call_operand.vmem [shape: f32[32,80], index: 8, kind: input, shape index: {}]   ;;  %s1685_s11 = inlined_call_operand.vmem [shape: f32[8,32], index: 11, kind: input, shape index: {}]   ;;  %s1686_s13 = inlined_call_operand.vmem [shape: f32[8,256], index: 13, kind: output, shape index: {}]  }
   0x1   :  { %v62_v0 = vld [vmem:[%s1673_s0 + $0x80] sm:$0xff]  ;;  %v63_v2 = vld [vmem:[%s1673_s0 + $0x88] sm:$0xff]  ;;  %v64_v4 = vld [vmem:[%s1673_s0 + $0x90] sm:$0xff]  ;;  %369 = vmatprep.mubr.f32.mxu0 %v1205_v32  ;;  %290 = vmatprep.mubr.f32.mxu1 %v1205_v32  ;;  %s1209_s25 = smov 127   ;;  %s1210_s26 = smov 1   ;;  %vm216_vm2 = vcmask 31744  }
   0x2   :  { %v46_v1 = vld [vmem:[%s1673_s0] sm:$0xff]  ;;  %110 = vxpose.xlu1.b32.start [1/16] (narrow) %v62_v0, 8  ;;  %v47_v3 = vld [vmem:[%s1673_s0 + $0x8] sm:$0xff]  ;;  %v48_v5 = vld [vmem:[%s1673_s0 + $0x10] sm:$0xff]  ;;  %s1211_s27 = smov 126   ;;  %s1212_s28 = smov 112  }
   0x3   :  { %78 = vxpose.xlu0.b32.start [1/16] (narrow) %v46_v1, 8  ;;  %v65_v6 = vld [vmem:[%s1673_s0 + $0x98] sm:$0xff]  ;;  %v66_v8 = vld [vmem:[%s1673_s0 + $0xa0] sm:$0xff]  ;;  %v67_v10 = vld [vmem:[%s1673_s0 + $0xa8] sm:$0xff]  ;;  %s1214_s30 = smov 124   ;;  %v152_v40 = vshrl.u32 %v146_v39, 7 }
   0x4   :  { %v49_v7 = vld [vmem:[%s1673_s0 + $0x18] sm:$0xff]  ;;  %v50_v9 = vld [vmem:[%s1673_s0 + $0x20] sm:$0xff]  ;;  %v51_v11 = vld [vmem:[%s1673_s0 + $0x28] sm:$0xff]  ;;  %v1400_v41 = vand.u32 127, %v146_v39  ;;  %vm677_vm6 = vcmask 326656   ;;  %vm865_vm7 = vcmask 654336  }
   0x5   :  { %v68_v12 = vld [vmem:[%s1673_s0 + $0xb0] sm:$0xff]  ;;  %v69_v14 = vld [vmem:[%s1673_s0 + $0xb8] sm:$0xff]  ;;  %v70_v16 = vld [vmem:[%s1673_s0 + $0xc0] sm:$0xff]  ;;  %v153_v42 = vsub.s32 0, %v152_v40  ;;  %v187_v54 = vsub.s32 3, %v152_v40  ;;  %v170_v57 = vsub.s32 1, %v152_v40 }
   0x6   :  { %111 = vxpose.xlu1.b32.cont [2/16] (narrow) %v63_v2, 8  ;;  %v52_v13 = vld [vmem:[%s1673_s0 + $0x30] sm:$0xff]  ;;  %v53_v15 = vld [vmem:[%s1673_s0 + $0x38] sm:$0xff]  ;;  %v54_v17 = vld [vmem:[%s1673_s0 + $0x40] sm:$0xff]  ;;  %vm148_vm0 = vcmp.lt.s32.totalorder %v1400_v41, 2  ;;  %vm182_vm3 = vcmp.lt.s32.totalorder %v1400_v41, 127 }
   0x7   :  { %79 = vxpose.xlu0.b32.cont [2/16] (narrow) %v47_v3, 8  ;;  %v71_v18 = vld [vmem:[%s1673_s0 + $0xc8] sm:$0xff]  ;;  %v72_v20 = vld [vmem:[%s1673_s0 + $0xd0] sm:$0xff]  ;;  %v73_v22 = vld [vmem:[%s1673_s0 + $0xd8] sm:$0xff]  ;;  %vm165_vm4 = vcmp.lt.s32.totalorder %v1400_v41, 1  ;;  %v204_v3 = vsub.s32 4, %v152_v40 }
   0x8   :  { %v55_v19 = vld [vmem:[%s1673_s0 + $0x48] sm:$0xff]  ;;  %v56_v21 = vld [vmem:[%s1673_s0 + $0x50] sm:$0xff]  ;;  %v57_v23 = vld [vmem:[%s1673_s0 + $0x58] sm:$0xff]  ;;  %vm199_vm5 = vcmp.lt.s32.totalorder %v1400_v41, 126  ;;  %vm1046_vm8 = vcmask 261120  }
   0x9   :  { %v74_v24 = vld [vmem:[%s1673_s0 + $0xe0] sm:$0xff]  ;;  %v75_v26 = vld [vmem:[%s1673_s0 + $0xe8] sm:$0xff]  ;;  %v76_v28 = vld [vmem:[%s1673_s0 + $0xf0] sm:$0xff] }
   0xa   :  { %112 = vxpose.xlu1.b32.cont [3/16] (narrow) %v64_v4, 8  ;;  %v58_v25 = vld [vmem:[%s1673_s0 + $0x60] sm:$0xff]  ;;  %v59_v27 = vld [vmem:[%s1673_s0 + $0x68] sm:$0xff]  ;;  %v60_v29 = vld [vmem:[%s1673_s0 + $0x70] sm:$0xff] }
   0xb   :  { %80 = vxpose.xlu0.b32.cont [3/16] (narrow) %v48_v5, 8  ;;  %v77_v30 = vld [vmem:[%s1673_s0 + $0xf8] sm:$0xff]  ;;  %v212_v35 = vld [vmem:[%s1674_s2] sm:$0xff]  ;;  %v45_v44 = vld [vmem:[%s1677_s1 + $0x8] sm:$0x1f] }
   0xc   :  { %v61_v31 = vld [vmem:[%s1673_s0 + $0x78] sm:$0xff]  ;;  %s1208_s0 = smov 116   ;;  %v633_v37 = vld [vmem:[%s1675_s4] sm:$0xff]  ;;  %v1411_v46 = vrot.slane %v45_v44, %v153_v42  ;;  %v1428_v59 = vrot.slane %v45_v44, %v187_v54  ;;  %v1440_v4 = vrot.slane %v45_v44, %v170_v57  ;;  %v862_v41 = vld [vmem:[%s1684_s8 + $0x8] sm:$0xff] }
   0xd   :  { %v625_v38 = vld [vmem:[%s1676_s3] sm:$0xff] }
   0xe   :  { %113 = vxpose.xlu1.b32.cont [4/16] (narrow) %v65_v6, 8  ;;  %v44_v43 = vld [vmem:[%s1677_s1] sm:$0x1f] }
   0xf   :  { %81 = vxpose.xlu0.b32.cont [4/16] (narrow) %v49_v7, 8  ;;  %v1409_v45 = vrot.slane %v44_v43, %v153_v42  ;;  %v1426_v58 = vrot.slane %v44_v43, %v187_v54  ;;  %v1435_v63 = vrot.slane %v44_v43, %v170_v57 }
  0x12   :  { %114 = vxpose.xlu1.b32.cont [5/16] (narrow) %v66_v8, 8 }
  0x13   :  { %82 = vxpose.xlu0.b32.cont [5/16] (narrow) %v50_v9, 8  ;;  %v1451_v9 = vrot.slane %v44_v43, %v204_v3 }
  0x16   :  { %115 = vxpose.xlu1.b32.cont [6/16] (narrow) %v67_v10, 8  ;;  %v1453_v10 = vrot.slane %v45_v44, %v204_v3 }
  0x17   :  { %83 = vxpose.xlu0.b32.cont [6/16] (narrow) %v51_v11, 8 }
  0x1a   :  { %116 = vxpose.xlu1.b32.cont [7/16] (narrow) %v68_v12, 8 }
  0x1b   :  { %84 = vxpose.xlu0.b32.cont [7/16] (narrow) %v52_v13, 8 }
  0x1e   :  { %117 = vxpose.xlu1.b32.cont [8/16] (narrow) %v69_v14, 8 }
  0x1f   :  { %85 = vxpose.xlu0.b32.cont [8/16] (narrow) %v53_v15, 8 }
  0x22   :  { %118 = vxpose.xlu1.b32.cont [9/16] (narrow) %v70_v16, 8 }
  0x23   :  { %86 = vxpose.xlu0.b32.cont [9/16] (narrow) %v54_v17, 8 }
  0x26   :  { %119 = vxpose.xlu1.b32.cont [10/16] (narrow) %v71_v18, 8 }
  0x27   :  { %87 = vxpose.xlu0.b32.cont [10/16] (narrow) %v55_v19, 8 }
  0x2a   :  { %120 = vxpose.xlu1.b32.cont [11/16] (narrow) %v72_v20, 8 }
  0x2b   :  { %88 = vxpose.xlu0.b32.cont [11/16] (narrow) %v56_v21, 8 }
  0x2e   :  { %121 = vxpose.xlu1.b32.cont [12/16] (narrow) %v73_v22, 8 }
  0x2f   :  { %89 = vxpose.xlu0.b32.cont [12/16] (narrow) %v57_v23, 8 }
  0x32   :  { %122 = vxpose.xlu1.b32.cont [13/16] (narrow) %v74_v24, 8 }
  0x33   :  { %90 = vxpose.xlu0.b32.cont [13/16] (narrow) %v58_v25, 8 }
  0x36   :  { %123 = vxpose.xlu1.b32.cont [14/16] (narrow) %v75_v26, 8 }
  0x37   :  { %91 = vxpose.xlu0.b32.cont [14/16] (narrow) %v59_v27, 8 }
  0x3a   :  { %124 = vxpose.xlu1.b32.cont [15/16] (narrow) %v76_v28, 8 }
  0x3b   :  { %92 = vxpose.xlu0.b32.cont [15/16] (narrow) %v60_v29, 8 }
  0x3e   :  { %125 = vxpose.xlu1.b32.end [16/16] (narrow) %v77_v30, 8 }
  0x3f   :  { %93 = vxpose.xlu0.b32.end [16/16] (narrow) %v61_v31, 8 }
  0x5c   :  { %1203 = vset.pattern.permute.xlu1 %v1213_v36 }
  0x68   :  { %1204 = vset.pattern.permute.xlu0 %v1213_v36  ;;  %v777_v36 = vld [vmem:[%s1679_s7] sm:$0xff] }
  0x82   :  { %v126_v33 = vpop.trf.xlu1 }
  0x83   :  { %v94_v34 = vpop.trf.xlu0  ;;  %144 = vrot.lane.b32.xlu1 %v126_v33, %s1206_s21 }
  0x84   :  { %142 = vrot.lane.b32.xlu0 %v94_v34, %s1206_s21 }
  0x87   :  { %376 = vrot.lane.b32.xlu1 %v212_v35, %s1207_s24 }
  0x88   :  { %459 = vrot.lane.b32.xlu0 %v212_v35, %s1208_s0 }
  0x8b   :  { %178 = vrot.lane.b32.xlu1 %v94_v34, %s1209_s25 }
  0x8c   :  { %163 = vrot.lane.b32.xlu0 %v126_v33, %s1210_s26 }
  0x8f   :  { %180 = vrot.lane.b32.xlu1 %v126_v33, %s1209_s25 }
  0x90   :  { %197 = vrot.lane.b32.xlu0 %v126_v33, %s1211_s27 }
  0x93   :  { %161 = vrot.lane.b32.xlu1 %v94_v34, %s1210_s26 }
  0x94   :  { %542 = vrot.lane.b32.xlu0 %v212_v35, %s1212_s28 }
  0x97   :  { %195 = vrot.lane.b32.xlu1 %v94_v34, %s1211_s27 }
  0x98   :  { %636 = vperm.xlu0 %1204, %v633_v37   ;;  %v762_v37 = vld [vmem:[%s1678_s6 + $0x8] sm:$0xff] }
  0x9b   :  { %214 = vrot.lane.b32.xlu1 %v212_v35, %s1214_s30 }
  0x9f   :  { %628 = vperm.xlu1 %1203, %v625_v38   ;;  %v778_v38 = vld [vmem:[%s1679_s7 + $0x8] sm:$0xff] }
  0xf5   :  { %v145_v47 = vpop.permute.xlu1 %144 }
  0xf6   :  { %v143_v48 = vpop.permute.xlu0 %142 }
  0xf7   :  { %v149_v49 = vsel %vm148_vm0, %v143_v48, %v145_v47  ;;  %v150_v50 = vsel %vm148_vm0, %v145_v47, %v143_v48 }
  0xf8   :  { %v159_v51 = vmul.f32 %v1409_v45, %v150_v50  ;;  %v160_v52 = vmul.f32 %v1411_v46, %v149_v49 }
  0xf9   :  { %v377_v53 = vpop.permute.xlu1 %376 }
  0xfa   :  { %1130 = vmatprep.subr.msk.mxu0 %vm219_vm1, %v160_v52  ;;  %v460_v55 = vpop.permute.xlu0 %459 }
  0xfb   :  { %1131 = vmatpush1.msk.msra.mxu0 %vm219_vm1, %v159_v51 }
  0xfc   :  { %1132 = vmatmul.mubr.msk.f32.vlgmr.msra.gmra.mrb[0].mxu0 %vm216_vm2, %v212_v35  ;;  %1133 = vmatprep.subr.msk.mxu0 %vm219_vm1, %v126_v33  ;;  %v761_v35 = vld [vmem:[%s1678_s6] sm:$0xff] }
  0xfd   :  { %1134 = vmatpush1.msk.msra.mxu0 %vm219_vm1, %v94_v34  ;;  %450 = vmatprep.mubr.f32.mxu0 %v1205_v32  ;;  %v179_v56 = vpop.permute.xlu1 %178 }
  0xfe   :  { %v164_v0 = vpop.permute.xlu0 %163 }
 0x101   :  { %v181_v60 = vpop.permute.xlu1 %180 }
 0x102   :  { %v183_v61 = vsel %vm182_vm3, %v179_v56, %v181_v60  ;;  %v184_v62 = vsel %vm182_vm3, %v181_v60, %v179_v56  ;;  %v198_v12 = vpop.permute.xlu0 %197 }
 0x103   :  { %v193_v1 = vmul.f32 %v1426_v58, %v183_v61  ;;  %v194_v2 = vmul.f32 %v1428_v59, %v184_v62 }
 0x104   :  { %1135 = vmatmul.mubr.msk.f32.vlgmr.msra.gmra.mrb[0].mxu0 %vm216_vm2, %v377_v53 }
 0x105   :  { %533 = vmatprep.mubr.f32.mxu0 %v1205_v32  ;;  %v162_v5 = vpop.permute.xlu1 %161  ;;  %1136 = vmatprep.subr.msk.mxu0 %vm219_vm1, %v194_v2 }
 0x106   :  { %v166_v6 = vsel %vm165_vm4, %v162_v5, %v164_v0  ;;  %v167_v7 = vsel %vm165_vm4, %v164_v0, %v162_v5  ;;  %1137 = vmatpush1.msk.msra.mxu0 %vm219_vm1, %v193_v1  ;;  %v543_v19 = vpop.permute.xlu0 %542 }
 0x107   :  { %v176_v8 = vmul.f32 %v1435_v63, %v167_v7  ;;  %v177_v11 = vmul.f32 %v1440_v4, %v166_v6 }
 0x109   :  { %v196_v13 = vpop.permute.xlu1 %195  ;;  %1127 = vmatprep.subr.msk.mxu1 %vm219_vm1, %v177_v11 }
 0x10a   :  { %v200_v14 = vsel %vm199_vm5, %v196_v13, %v198_v12  ;;  %v201_v15 = vsel %vm199_vm5, %v198_v12, %v196_v13  ;;  %1128 = vmatpush1.msk.msra.mxu1 %vm219_vm1, %v176_v8  ;;  %v675_v12 = vld [vmem:[%s1680_s5] sm:$0xff]  ;;  %v676_v13 = vld [vmem:[%s1680_s5 + $0x8] sm:$0xff] }
 0x10b   :  { %v210_v16 = vmul.f32 %v1451_v9, %v200_v14  ;;  %v211_v17 = vmul.f32 %v1453_v10, %v201_v15 }
 0x10c   :  { %1138 = vmatmul.mubr.msk.f32.vlgmr.msra.gmra.mrb[0].mxu0 %vm216_vm2, %v460_v55 }
 0x10d   :  { %616 = vmatprep.mubr.f32.mxu0 %v1205_v32  ;;  %1139 = vmatprep.subr.msk.mxu0 %vm219_vm1, %v211_v17  ;;  %v215_v18 = vpop.permute.xlu1 %214 }
 0x10e   :  { %1140 = vmatpush1.msk.msra.mxu0 %vm219_vm1, %v210_v16  ;;  %1129 = vmatmul.mubr.msk.f32.vlgmr.msra.gmra.mrb[0].mxu1 %vm216_vm2, %v215_v18 }
 0x10f   :  { %942 = vmatprep.mubr.f32.mxu1 %v1205_v32 }
 0x114   :  { %1141 = vmatmul.mubr.msk.f32.vlgmr.msra.gmra.mrb[0].mxu0 %vm216_vm2, %v543_v19 }
 0x115   :  { %748 = vmatprep.mubr.f32.mxu0 %v1205_v32 }
 0x117   :  { %v637_v27 = vpop.permute.xlu0 %636 }
 0x11e   :  { %v629_v23 = vpop.permute.xlu1 %628 }
 0x1e1   :  { %v292_v20 = vpop.f32.mrb[0].mxu1 }
 0x1e2   :  { %v294_v21 = vpop.f32.mrb[1].mxu1 }
 0x1e7   :  { %v618_v22 = vpop.f32.mrb[0].mxu0 }
 0x1e8   :  { %v1185_v24 = vadd.f32 %v618_v22, %v292_v20  ;;  %v620_v25 = vpop.f32.mrb[1].mxu0 }
 0x1e9   :  { %v1186_v26 = vadd.f32 %v620_v25, %v294_v21 }
 0x1ea   :  { %v631_v28 = vmul.f32 %v1185_v24, %v629_v23 }
 0x1eb   :  { %v632_v29 = vmul.f32 %v1186_v26, %v629_v23 }
 0x1ec   :  { %v639_v30 = vadd.f32 %v637_v27, %v631_v28 }
 0x1ed   :  { %v640_v31 = vadd.f32 %v637_v27, %v632_v29 }
 0x1ee   :  { %v641_v33 = vmax.f32 %v639_v30, 0.0 }
 0x1ef   :  { %v642_v34 = vmax.f32 %v640_v31, 0.0 }
 0x1f0   :  { %651 = vrot.lane.b32.xlu0 %v641_v33, %s1210_s26  ;;  %643 = vrot.lane.b32.xlu1 %v641_v33, %s1206_s21 }
 0x1f4   :  { %659 = vrot.lane.b32.xlu0 %v641_v33, %s1209_s25  ;;  %645 = vrot.lane.b32.xlu1 %v642_v34, %s1206_s21 }
 0x1f8   :  { %667 = vrot.lane.b32.xlu0 %v641_v33, %s1211_s27  ;;  %653 = vrot.lane.b32.xlu1 %v642_v34, %s1210_s26 }
 0x1fc   :  { %765 = vperm.xlu0 %1204, %v761_v35   ;;  %661 = vrot.lane.b32.xlu1 %v642_v34, %s1209_s25 }
 0x200   :  { %781 = vperm.xlu0 %1204, %v777_v36   ;;  %669 = vrot.lane.b32.xlu1 %v642_v34, %s1211_s27 }
 0x204   :  { %770 = vperm.xlu1 %1203, %v762_v37   ;;  %v967_v37 = vld [vmem:[%s1681_s9] sm:$0xff] }
 0x208   :  { %786 = vperm.xlu1 %1203, %v778_v38   ;;  %v999_v38 = vld [vmem:[%s1682_s10] sm:$0xff] }
 0x262   :  { %v644_v39 = vpop.permute.xlu1 %643  ;;  %v652_v40 = vpop.permute.xlu0 %651 }
 0x266   :  { %v646_v42 = vpop.permute.xlu1 %645  ;;  %v660_v50 = vpop.permute.xlu0 %659 }
 0x267   :  { %v647_v43 = vsel %vm148_vm0, %v644_v39, %v646_v42  ;;  %v648_v44 = vsel %vm148_vm0, %v646_v42, %v644_v39  ;;  %v968_v39 = vld [vmem:[%s1681_s9 + $0x8] sm:$0xff] }
 0x268   :  { %v649_v51 = vmul.f32 %v648_v44, %v1409_v45  ;;  %v650_v52 = vmul.f32 %v647_v43, %v1411_v46  ;;  %v1000_v42 = vld [vmem:[%s1682_s10 + $0x8] sm:$0xff]  ;;  %v1001_v43 = vld [vmem:[%s1682_s10 + $0x10] sm:$0xff]  ;;  %v970_v44 = vld [vmem:[%s1681_s9 + $0x18] sm:$0xff] }
 0x26a   :  { %v654_v47 = vpop.permute.xlu1 %653  ;;  %v668_v1 = vpop.permute.xlu0 %667 }
 0x26b   :  { %v655_v48 = vsel %vm165_vm4, %v652_v40, %v654_v47  ;;  %v656_v49 = vsel %vm165_vm4, %v654_v47, %v652_v40  ;;  %v969_v40 = vld [vmem:[%s1681_s9 + $0x10] sm:$0xff]  ;;  %v1040_v47 = vld [vmem:[%s1683_s12] sm:$0xff] }
 0x26c   :  { %v657_v53 = vmul.f32 %v656_v49, %v1435_v63  ;;  %v658_v54 = vmul.f32 %v655_v48, %v1440_v4  ;;  %v1002_v48 = vld [vmem:[%s1682_s10 + $0x18] sm:$0xff] }
 0x26e   :  { %v1151_v55 = vpack.c.bf16 %v657_v53, %v649_v51  ;;  %v662_v56 = vpop.permute.xlu1 %661  ;;  %v1149_v57 = vpack.c.bf16 %v658_v54, %v650_v52 }
 0x26f   :  { %v663_v60 = vsel %vm182_vm3, %v660_v50, %v662_v56  ;;  %v664_v61 = vsel %vm182_vm3, %v662_v56, %v660_v50 }
 0x270   :  { %v665_v62 = vmul.f32 %v663_v60, %v1426_v58  ;;  %v666_v0 = vmul.f32 %v664_v61, %v1428_v59  ;;  %1150 = vmatprep.subr.bf16.mxu0 %v1149_v57 }
 0x271   :  { %1152 = vmatpush1.bf16.msra.mxu0 %v1151_v55 }
 0x272   :  { %v1155_v2 = vpack.c.bf16 %v665_v62, %v641_v33  ;;  %v670_v3 = vpop.permute.xlu1 %669  ;;  %v1153_v5 = vpack.c.bf16 %v666_v0, %v642_v34 }
 0x273   :  { %v672_v6 = vsel %vm199_vm5, %v670_v3, %v668_v1  ;;  %v671_v7 = vsel %vm199_vm5, %v668_v1, %v670_v3 }
 0x274   :  { %v674_v8 = vmul.f32 %v672_v6, %v1453_v10  ;;  %1154 = vmatprep.subr.bf16.mxu0 %v1153_v5  ;;  %v673_v11 = vmul.f32 %v671_v7, %v1451_v9 }
 0x275   :  { %1156 = vmatpush1.bf16.msra.mxu0 %v1155_v2 }
 0x276   :  { %692 = vmatprep.subr.mxu0 %v674_v8 }
 0x279   :  { %693 = vmatpush1.msra.mxu0 %v673_v11 }
 0x27a   :  { %1142 = vmatmul.mubr.msk.f32.vlgmr.msra.gmra.mrb[2].mxu0 %vm677_vm6, %v675_v12 }
 0x27b   :  { %754 = vmatprep.mubr.f32.mxu0 %v1205_v32  ;;  %v766_v14 = vpop.permute.xlu0 %765 }
 0x27e   :  { %1143 = vmatmul.mubr.msk.f32.gmra.mrb[4].mxu0 %vm677_vm6, %v676_v13 }
 0x27f   :  { %1114 = vmatprep.mubr.f32.mxu0 %v1205_v32  ;;  %v782_v19 = vpop.permute.xlu0 %781 }
 0x283   :  { %v771_v15 = vpop.permute.xlu1 %770 }
 0x287   :  { %v787_v26 = vpop.permute.xlu1 %786 }
 0x34d   :  { %v750_v16 = vpop.f32.mrb[2].mxu0 }
 0x34e   :  { %v773_v17 = vmul.f32 %v766_v14, %v750_v16  ;;  %v752_v18 = vpop.f32.mrb[3].mxu0 }
 0x34f   :  { %v774_v20 = vmul.f32 %v766_v14, %v752_v18 }
 0x350   :  { %v789_v21 = vadd.f32 %v782_v19, %v773_v17 }
 0x351   :  { %v756_v22 = vpop.f32.mrb[4].mxu0  ;;  %v790_v27 = vadd.f32 %v782_v19, %v774_v20 }
 0x352   :  { %v1524_v23 = vmax.f32 %v789_v21, 0.0  ;;  %v775_v24 = vmul.f32 %v771_v15, %v756_v22  ;;  %v758_v25 = vpop.f32.mrb[5].mxu0 }
 0x353   :  { %v776_v28 = vmul.f32 %v771_v15, %v758_v25  ;;  %v1530_v33 = vmax.f32 %v790_v27, 0.0 }
 0x354   :  { %v791_v29 = vadd.f32 %v787_v26, %v775_v24  ;;  %797 = vrot.lane.b32.xlu0 %v1524_v23, %s1206_s21 }
 0x355   :  { %v792_v30 = vadd.f32 %v787_v26, %v776_v28 }
 0x356   :  { %v1528_v31 = vmax.f32 %v791_v29, 0.0 }
 0x357   :  { %v1532_v34 = vmax.f32 %v792_v30, 0.0 }
 0x358   :  { %813 = vrot.lane.b32.xlu0 %v1524_v23, %s1210_s26  ;;  %799 = vrot.lane.b32.xlu1 %v1528_v31, %s1206_s21  ;;  %v1167_v35 = vpack.c.bf16 %v1528_v31, %v1524_v23 }
 0x359   :  { %v1165_v36 = vpack.c.bf16 %v1532_v34, %v1530_v33 }
 0x35c   :  { %829 = vrot.lane.b32.xlu0 %v1524_v23, %s1209_s25  ;;  %815 = vrot.lane.b32.xlu1 %v1528_v31, %s1210_s26 }
 0x360   :  { %801 = vrot.lane.b32.xlu0 %v1530_v33, %s1206_s21  ;;  %831 = vrot.lane.b32.xlu1 %v1528_v31, %s1209_s25 }
 0x364   :  { %817 = vrot.lane.b32.xlu0 %v1530_v33, %s1210_s26  ;;  %803 = vrot.lane.b32.xlu1 %v1532_v34, %s1206_s21 }
 0x368   :  { %845 = vrot.lane.b32.xlu0 %v1524_v23, %s1211_s27  ;;  %819 = vrot.lane.b32.xlu1 %v1532_v34, %s1210_s26 }
 0x36c   :  { %833 = vrot.lane.b32.xlu0 %v1530_v33, %s1209_s25  ;;  %847 = vrot.lane.b32.xlu1 %v1528_v31, %s1211_s27 }
 0x370   :  { %849 = vrot.lane.b32.xlu0 %v1530_v33, %s1211_s27  ;;  %835 = vrot.lane.b32.xlu1 %v1532_v34, %s1209_s25 }
 0x374   :  { %973 = vperm.xlu0 %1204, %v967_v37   ;;  %851 = vrot.lane.b32.xlu1 %v1532_v34, %s1211_s27 }
 0x378   :  { %1005 = vperm.xlu0 %1204, %v999_v38   ;;  %978 = vperm.xlu1 %1203, %v968_v39  }
 0x37c   :  { %983 = vperm.xlu0 %1204, %v969_v40   ;;  %1010 = vperm.xlu1 %1203, %v1000_v42  }
 0x380   :  { %1015 = vperm.xlu0 %1204, %v1001_v43   ;;  %988 = vperm.xlu1 %1203, %v970_v44  }
 0x384   :  { %1043 = vperm.xlu0 %1204, %v1040_v47   ;;  %1020 = vperm.xlu1 %1203, %v1002_v48  }
 0x3c6   :  { %v798_v49 = vpop.permute.xlu0 %797 }
 0x3ca   :  { %v814_v50 = vpop.permute.xlu0 %813  ;;  %v800_v51 = vpop.permute.xlu1 %799 }
 0x3ce   :  { %v830_v52 = vpop.permute.xlu0 %829  ;;  %v816_v53 = vpop.permute.xlu1 %815 }
 0x3d2   :  { %v802_v54 = vpop.permute.xlu0 %801  ;;  %v832_v55 = vpop.permute.xlu1 %831 }
 0x3d3   :  { %v805_v56 = vsel %vm148_vm0, %v798_v49, %v802_v54  ;;  %v807_v57 = vsel %vm148_vm0, %v802_v54, %v798_v49 }
 0x3d4   :  { %v809_v1 = vmul.f32 %v807_v57, %v1409_v45  ;;  %v810_v2 = vmul.f32 %v805_v56, %v1411_v46 }
 0x3d6   :  { %v818_v60 = vpop.permute.xlu0 %817  ;;  %v804_v61 = vpop.permute.xlu1 %803 }
 0x3d7   :  { %v806_v62 = vsel %vm148_vm0, %v800_v51, %v804_v61  ;;  %v808_v0 = vsel %vm148_vm0, %v804_v61, %v800_v51  ;;  %v821_v6 = vsel %vm165_vm4, %v814_v50, %v818_v60  ;;  %v823_v7 = vsel %vm165_vm4, %v818_v60, %v814_v50 }
 0x3d8   :  { %v811_v3 = vmul.f32 %v808_v0, %v1409_v45  ;;  %v812_v5 = vmul.f32 %v806_v62, %v1411_v46  ;;  %v825_v45 = vmul.f32 %v823_v7, %v1435_v63  ;;  %v826_v46 = vmul.f32 %v821_v6, %v1440_v4 }
 0x3da   :  { %v1159_v8 = vpack.c.bf16 %v811_v3, %v809_v1  ;;  %v846_v11 = vpop.permute.xlu0 %845  ;;  %v820_v12 = vpop.permute.xlu1 %819  ;;  %v1157_v13 = vpack.c.bf16 %v812_v5, %v810_v2 }
 0x3db   :  { %v822_v14 = vsel %vm165_vm4, %v816_v53, %v820_v12  ;;  %v824_v15 = vsel %vm165_vm4, %v820_v12, %v816_v53 }
 0x3dc   :  { %v827_v16 = vmul.f32 %v824_v15, %v1435_v63  ;;  %v828_v17 = vmul.f32 %v822_v14, %v1440_v4  ;;  %1158 = vmatprep.subr.bf16.mxu1 %v1157_v13 }
 0x3dd   :  { %1160 = vmatpush1.bf16.msra.mxu1 %v1159_v8 }
 0x3de   :  { %v1163_v18 = vpack.c.bf16 %v827_v16, %v825_v45  ;;  %v834_v19 = vpop.permute.xlu0 %833  ;;  %v848_v20 = vpop.permute.xlu1 %847  ;;  %v1161_v21 = vpack.c.bf16 %v828_v17, %v826_v46 }
 0x3df   :  { %v837_v22 = vsel %vm182_vm3, %v830_v52, %v834_v19  ;;  %v839_v24 = vsel %vm182_vm3, %v834_v19, %v830_v52 }
 0x3e0   :  { %1162 = vmatprep.subr.bf16.mxu1 %v1161_v21  ;;  %v841_v27 = vmul.f32 %v837_v22, %v1426_v58  ;;  %v842_v28 = vmul.f32 %v839_v24, %v1428_v59 }
 0x3e1   :  { %1164 = vmatpush1.bf16.msra.mxu1 %v1163_v18 }
 0x3e2   :  { %v850_v25 = vpop.permute.xlu0 %849  ;;  %1166 = vmatprep.subr.bf16.mxu1 %v1165_v36  ;;  %v836_v63 = vpop.permute.xlu1 %835 }
 0x3e3   :  { %v838_v4 = vsel %vm182_vm3, %v832_v55, %v836_v63  ;;  %v840_v26 = vsel %vm182_vm3, %v836_v63, %v832_v55  ;;  %v853_v37 = vsel %vm199_vm5, %v846_v11, %v850_v25  ;;  %v855_v33 = vsel %vm199_vm5, %v850_v25, %v846_v11 }
 0x3e4   :  { %v843_v29 = vmul.f32 %v838_v4, %v1426_v58  ;;  %v844_v30 = vmul.f32 %v840_v26, %v1428_v59  ;;  %v857_v59 = vmul.f32 %v853_v37, %v1451_v9  ;;  %v858_v40 = vmul.f32 %v855_v33, %v1453_v10 }
 0x3e5   :  { %1168 = vmatpush1.bf16.msra.mxu1 %v1167_v35  ;;  %v861_v35 = vld [vmem:[%s1684_s8] sm:$0xff] }
 0x3e6   :  { %v1171_v34 = vpack.c.bf16 %v843_v29, %v841_v27  ;;  %v852_v36 = vpop.permute.xlu1 %851  ;;  %v1169_v38 = vpack.c.bf16 %v844_v30, %v842_v28  ;;  %v1039_v28 = vld [vmem:[%s1685_s11] sm:$0xff] }
 0x3e7   :  { %v854_v39 = vsel %vm199_vm5, %v848_v20, %v852_v36  ;;  %v856_v58 = vsel %vm199_vm5, %v852_v36, %v848_v20 }
 0x3e8   :  { %v859_v42 = vmul.f32 %v854_v39, %v1451_v9  ;;  %v860_v43 = vmul.f32 %v856_v58, %v1453_v10  ;;  %1170 = vmatprep.subr.bf16.mxu1 %v1169_v38  ;;  %v863_v9 = vld [vmem:[%s1684_s8 + $0x10] sm:$0xff]  ;;  %v864_v10 = vld [vmem:[%s1684_s8 + $0x18] sm:$0xff] }
 0x3e9   :  { %1172 = vmatpush1.bf16.msra.mxu1 %v1171_v34 }
 0x3ea   :  { %v1175_v23 = vpack.c.bf16 %v859_v42, %v857_v59  ;;  %v1173_v31 = vpack.c.bf16 %v860_v43, %v858_v40 }
 0x3ec   :  { %1174 = vmatprep.subr.bf16.mxu1 %v1173_v31 }
 0x3ed   :  { %1176 = vmatpush1.bf16.msra.mxu1 %v1175_v23 }
 0x3f0   :  { %1144 = vmatmul.mubr.msk.f32.vlgmr.msra.gmra.mrb[2].mxu1 %vm865_vm7, %v861_v35 }
 0x3f1   :  { %948 = vmatprep.mubr.f32.mxu1 %v1205_v32 }
 0x3f3   :  { %v974_v44 = vpop.permute.xlu0 %973 }
 0x3f4   :  { %1145 = vmatmul.mubr.msk.f32.gmra.mrb[4].mxu1 %vm865_vm7, %v862_v41 }
 0x3f5   :  { %954 = vmatprep.mubr.f32.mxu1 %v1205_v32 }
 0x3f7   :  { %v979_v47 = vpop.permute.xlu1 %978  ;;  %v1006_v48 = vpop.permute.xlu0 %1005 }
 0x3f8   :  { %1146 = vmatmul.mubr.msk.f32.gmra.mrb[6].mxu1 %vm865_vm7, %v863_v9 }
 0x3f9   :  { %960 = vmatprep.mubr.f32.mxu1 %v1205_v32 }
 0x3fb   :  { %v1011_v52 = vpop.permute.xlu1 %1010  ;;  %v984_v60 = vpop.permute.xlu0 %983 }
 0x3fc   :  { %1147 = vmatmul.mubr.msk.f32.gmra.mrb[8].mxu1 %vm865_vm7, %v864_v10 }
 0x3ff   :  { %v989_v0 = vpop.permute.xlu1 %988  ;;  %v1016_v14 = vpop.permute.xlu0 %1015 }
 0x403   :  { %v1021_v18 = vpop.permute.xlu1 %1020  ;;  %v1044_v29 = vpop.permute.xlu0 %1043 }
 0x4c3   :  { %v944_v49 = vpop.f32.mrb[2].mxu1 }
 0x4c4   :  { %v991_v50 = vmul.f32 %v974_v44, %v944_v49  ;;  %v946_v51 = vpop.f32.mrb[3].mxu1 }
 0x4c5   :  { %v992_v53 = vmul.f32 %v974_v44, %v946_v51 }
 0x4c6   :  { %v1023_v55 = vadd.f32 %v1006_v48, %v991_v50 }
 0x4c7   :  { %v950_v54 = vpop.f32.mrb[4].mxu1  ;;  %v1024_v61 = vadd.f32 %v1006_v48, %v992_v53 }
 0x4c8   :  { %v993_v56 = vmul.f32 %v979_v47, %v950_v54  ;;  %v952_v57 = vpop.f32.mrb[5].mxu1  ;;  %v1031_v3 = vmax.f32 %v1023_v55, 0.0 }
 0x4c9   :  { %v994_v32 = vmul.f32 %v979_v47, %v952_v57  ;;  %v1032_v8 = vmax.f32 %v1024_v61, 0.0 }
 0x4ca   :  { %v1025_v62 = vadd.f32 %v1011_v52, %v993_v56 }
 0x4cb   :  { %v1026_v1 = vadd.f32 %v1011_v52, %v994_v32  ;;  %v956_v2 = vpop.f32.mrb[6].mxu1 }
 0x4cc   :  { %v1033_v5 = vmax.f32 %v1025_v62, 0.0  ;;  %v995_v6 = vmul.f32 %v984_v60, %v956_v2  ;;  %v958_v7 = vpop.f32.mrb[7].mxu1 }
 0x4cd   :  { %v1034_v11 = vmax.f32 %v1026_v1, 0.0  ;;  %v996_v12 = vmul.f32 %v984_v60, %v958_v7 }
 0x4ce   :  { %v1179_v13 = vpack.c.bf16 %v1033_v5, %v1031_v3  ;;  %v1027_v46 = vadd.f32 %v1016_v14, %v995_v6 }
 0x4cf   :  { %v962_v15 = vpop.f32.mrb[8].mxu1  ;;  %v1177_v45 = vpack.c.bf16 %v1034_v11, %v1032_v8  ;;  %v1028_v19 = vadd.f32 %v1016_v14, %v996_v12 }
 0x4d0   :  { %v997_v16 = vmul.f32 %v989_v0, %v962_v15  ;;  %v964_v17 = vpop.f32.mrb[9].mxu1  ;;  %v1035_v24 = vmax.f32 %v1027_v46, 0.0 }
 0x4d1   :  { %v998_v20 = vmul.f32 %v989_v0, %v964_v17  ;;  %1178 = vmatprep.subr.bf16.mxu0 %v1177_v45  ;;  %v1036_v63 = vmax.f32 %v1028_v19, 0.0 }
 0x4d2   :  { %v1029_v21 = vadd.f32 %v1021_v18, %v997_v16  ;;  %1180 = vmatpush1.bf16.msra.mxu0 %v1179_v13 }
 0x4d3   :  { %v1030_v22 = vadd.f32 %v1021_v18, %v998_v20 }
 0x4d4   :  { %v1037_v25 = vmax.f32 %v1029_v21, 0.0 }
 0x4d5   :  { %v1038_v4 = vmax.f32 %v1030_v22, 0.0 }
 0x4d6   :  { %v1183_v26 = vpack.c.bf16 %v1037_v25, %v1035_v24 }
 0x4d7   :  { %v1181_v27 = vpack.c.bf16 %v1038_v4, %v1036_v63 }
 0x4d9   :  { %1182 = vmatprep.subr.bf16.mxu0 %v1181_v27 }
 0x4da   :  { %1184 = vmatpush1.bf16.msra.mxu0 %v1183_v26 }
 0x4dd   :  { %1148 = vmatmul.mubr.msk.f32.vlgmr.msra.gmra.mrb[6].mxu0 %vm1046_vm8, %v1039_v28 }
 0x5b0   :  { %v1116_v30 = vpop.f32.mrb[6].mxu0 }
 0x5b1   :  { %v1117_v37 = vadd.f32 %v1116_v30, %v1044_v29  ;;  %v1118_v33 = vpop.f32.mrb[7].mxu0 }
 0x5b2   :  { %v1119_v34 = vadd.f32 %v1118_v33, %v1044_v29 }
 0x5b3   :  { %1121 = vst [vmem:[%s1686_s13] sm:$0xff] %v1117_v37 }
 0x5b4   :  { %1122 = vst [vmem:[%s1686_s13 + $0x8] sm:$0xff] %v1119_v34 }

</bundles_post_ra>
